<compile_context>
chip_gen: v7x
topology: tpu7x:2x2x1
jax: 0.10.0
libtpu: 0.0.40
codegen_flags: <defaults>
</compile_context>

<pallas_src>
import math

import jax
import jax.numpy as jnp
from jax.experimental import pallas as pl
from jax.experimental.pallas import tpu as pltpu


def _fft_mlp_kernel(x_ref, w1_ref, w2_ref, o_ref):
    """out = W2 @ relu(W1 @ X) on a (2C, T) channel-major spatial tile.

    x_ref        : (1, 2C, T)  stacked [real; imag] frequency tile
    w1_ref, w2_ref : (2C, 2C)  PyTorch (out_ch, in_ch) 1x1-conv weights
    o_ref        : (1, 2C, T)  stacked [real; imag] conv output tile
    """
    x = x_ref[0]                                         # (2C, T)
    h = jnp.dot(w1_ref[...], x, preferred_element_type=jnp.float32)
    h = jnp.maximum(h, 0.0)
    o_ref[0] = jnp.dot(w2_ref[...], h,
                       preferred_element_type=jnp.float32).astype(o_ref.dtype)


def fft_mlp(x, w1, w2, *, tile_budget_bytes=8 * 1024 * 1024):
    """Pallas 1x1-conv chain (conv -> ReLU -> conv), channel-major, lane-dense.

    x      : (B, 2C, Sp) float32, Sp = padded(H*Wf) flattened spatial (lanes).
    w1, w2 : (2C, 2C) float32, PyTorch (out, in) layout, contracted as W @ X.
    Returns (B, 2C, Sp) float32.
    """
    B, C2, Sp = x.shape
    assert w1.shape == (C2, C2) and w2.shape == (C2, C2)

    lane = 128
    # Double-buffered in + out tile bytes per lane column (f32).
    bytes_per_lane = 2 * 2 * C2 * 4
    # Largest 128-multiple spatial tile that fits the VMEM tile budget; use the
    # full Sp whenever it fits (fewest grid steps -> least per-step overhead).
    ts_cap = max(lane, (tile_budget_bytes // bytes_per_lane) // lane * lane)
    ts = min(Sp, ts_cap)

    # v7x has two TensorCores: make sure the "parallel" grid has >= 2 points.
    if B * pl.cdiv(Sp, ts) < 2 and Sp >= 2 * lane:
        ts = ((Sp // 2 + lane - 1) // lane) * lane

    grid = (B, pl.cdiv(Sp, ts))

    # Realistic VMEM request: double-buffered in/out tiles + resident weights
    # + the ReLU intermediate, with 2x headroom, capped well under v7x's 64 MiB.
    footprint = (2 * 2 * C2 * ts * 4          # double-buffered input + output tiles
                 + 2 * 2 * C2 * C2 * 4        # (double-buffered) weight tiles
                 + C2 * ts * 4)               # relu intermediate
    vmem_limit = int(min(max(2 * footprint, 8 * 1024 * 1024), 32 * 1024 * 1024))

    dtype_bytes = 4
    cost = pl.CostEstimate(
        flops=4 * B * Sp * C2 * C2,                     # two (2C x 2C) mat-vecs / pixel
        transcendentals=0,
        bytes_accessed=2 * B * C2 * Sp * dtype_bytes + 2 * C2 * C2 * dtype_bytes,
    )

    return pl.pallas_call(
        _fft_mlp_kernel,
        out_shape=jax.ShapeDtypeStruct((B, C2, Sp), x.dtype),
        grid_spec=pltpu.PrefetchScalarGridSpec(
            num_scalar_prefetch=0,
            grid=grid,
            in_specs=[
                pl.BlockSpec((1, C2, ts), lambda b, t: (b, 0, t)),
                pl.BlockSpec((C2, C2), lambda b, t: (0, 0)),
                pl.BlockSpec((C2, C2), lambda b, t: (0, 0)),
            ],
            out_specs=pl.BlockSpec((1, C2, ts), lambda b, t: (b, 0, t)),
        ),
        compiler_params=pltpu.CompilerParams(
            dimension_semantics=("parallel", "parallel"),
            vmem_limit_bytes=vmem_limit,
        ),
        cost_estimate=cost,
    )(x, w1, w2)


def fft_block_forward(x, w1, w2):
    """Exact FFTBlock forward.  x: (B, C, H, W) float32, NCHW like PyTorch."""
    B, C, H, W = x.shape
    Wf = W // 2 + 1

    # TODO(synk): rfft2 / irfft2 have no Pallas TPU primitive; they stay in jnp.fft.
    y = jnp.fft.rfft2(x, norm="backward")                 # (B, C, H, Wf) complex64

    # padding=1 on each 1x1 conv + irfft2(s=(H,W)) crop => conv result shifted
    # by (+2,+2) with a zero border.  Bias-free convs + ReLU(0)=0 => shifting
    # the *input* is exactly equivalent; XLA fuses this with the real/imag
    # extraction and the channel concat below.
    def shift2(a):
        return jnp.pad(a[:, :, :H - 2, :Wf - 2], ((0, 0), (0, 0), (2, 0), (2, 0)))

    yf = jnp.concatenate([shift2(y.real), shift2(y.imag)], axis=1)   # (B, 2C, H, Wf)

    # Flatten spatial onto the lane axis and pad to a multiple of 128 so every
    # kernel store is lane-dense (pad columns are zeros -> conv output zeros,
    # cropped away afterwards).
    S = H * Wf
    Sp = ((S + 127) // 128) * 128
    yf = yf.reshape(B, 2 * C, S)
    if Sp > S:
        yf = jnp.pad(yf, ((0, 0), (0, 0), (0, Sp - S)))

    out = fft_mlp(yf, w1, w2)                            # (B, 2C, Sp)
    out = out[:, :, :S].reshape(B, 2 * C, H, Wf)

    y_c = jax.lax.complex(out[:, :C], out[:, C:])
    y_sp = jnp.fft.irfft2(y_c, s=(H, W), norm="backward").astype(x.dtype)
    return x + y_sp


def _reference_forward(x, w1, w2):
    """Pure-jnp replica of the PyTorch module (conv+pad -> relu -> conv+pad -> crop)."""
    B, C, H, W = x.shape
    Wf = W // 2 + 1
    hp = jax.lax.Precision.HIGHEST
    y = jnp.fft.rfft2(x, norm="backward")
    y_f = jnp.concatenate([y.real, y.imag], axis=1)                   # (B, 2C, H, Wf)
    h = jnp.einsum("oc,bchw->bohw", w1, y_f, precision=hp)
    h = jnp.pad(h, ((0, 0), (0, 0), (1, 1), (1, 1)))                  # conv1 padding=1
    h = jnp.maximum(h, 0.0)
    o = jnp.einsum("oc,bchw->bohw", w2, h, precision=hp)
    o = jnp.pad(o, ((0, 0), (0, 0), (1, 1), (1, 1)))                  # conv2 padding=1
    o = o[:, :, :H, :Wf]                                              # irfft2 s-crop
    o_r, o_i = jnp.split(o, 2, axis=1)
    return x + jnp.fft.irfft2(jax.lax.complex(o_r, o_i), s=(H, W), norm="backward")


if __name__ == "__main__":
    B, C, H, W = 2, 4, 16, 16
    key = jax.random.PRNGKey(0)
    k_x, k_w1, k_w2 = jax.random.split(key, 3)

    x = jax.random.normal(k_x, (B, C, H, W), dtype=jnp.float32)

    # DOConv2d(2C, 2C, k=1): M*N == 1 -> DoW == W reshaped to a plain (2C,2C,1,1)
    # conv weight, bias=False.  kaiming_uniform_(a=sqrt(5)) bound = 1/sqrt(2C).
    c2 = 2 * C
    bound = 1.0 / math.sqrt(c2)
    w1 = jax.random.uniform(k_w1, (c2, c2), minval=-bound, maxval=bound,
                            dtype=jnp.float32)
    w2 = jax.random.uniform(k_w2, (c2, c2), minval=-bound, maxval=bound,
                            dtype=jnp.float32)

    out = jax.jit(fft_block_forward)(x, w1, w2)
    jax.block_until_ready(out)
    assert out.shape == (B, C, H, W) and out.dtype == jnp.float32

    # Correctness check against a pure-jnp replica of the PyTorch forward.
    ref = jax.jit(_reference_forward)(x, w1, w2)
    jax.block_until_ready(ref)
    max_err = float(jnp.max(jnp.abs(out - ref)))
    scale = float(jnp.max(jnp.abs(ref)))
    assert max_err <= 5e-2 * scale + 1e-3, f"mismatch: max_err={max_err}, scale={scale}"

    print("KERNEL_OK")
</pallas_src>

<mosaic_0001>
module attributes {stable_mosaic.version = 11 : i64} {
  func.func @_fft_mlp_kernel(%arg0: i32, %arg1: i32, %arg2: memref<1x8x256xf32, #tpu.memory_space<vmem>>, %arg3: memref<8x8xf32, #tpu.memory_space<vmem>>, %arg4: memref<8x8xf32, #tpu.memory_space<vmem>>, %arg5: memref<1x8x256xf32, #tpu.memory_space<vmem>>) attributes {dimension_semantics = [#tpu.dimension_semantics<parallel>, #tpu.dimension_semantics<parallel>], iteration_bounds = array<i64: 2, 1>, scalar_prefetch = 0 : i64, scratch_operands = 0 : i64, tpu.core_type = #tpu.core_type<tc>, window_params = [{transform_indices = @transform_0, window_bounds = array<i64: 1, 8, 256>}, {pipeline_mode = #tpu.pipeline_mode<synchronous>, transform_indices = @transform_1, window_bounds = array<i64: 8, 8>}, {pipeline_mode = #tpu.pipeline_mode<synchronous>, transform_indices = @transform_2, window_bounds = array<i64: 8, 8>}, {transform_indices = @transform_3, window_bounds = array<i64: 1, 8, 256>}]} {
    %c0 = arith.constant 0 : index
    %c0_0 = arith.constant 0 : index
    %c0_1 = arith.constant 0 : index
    %0 = vector.load %arg2[%c0, %c0_0, %c0_1] : memref<1x8x256xf32, #tpu.memory_space<vmem>>, vector<1x8x256xf32>
    %1 = vector.shape_cast %0 : vector<1x8x256xf32> to vector<8x256xf32>
    %c0_2 = arith.constant 0 : index
    %c0_3 = arith.constant 0 : index
    %2 = vector.load %arg3[%c0_2, %c0_3] : memref<8x8xf32, #tpu.memory_space<vmem>>, vector<8x8xf32>
    %cst = arith.constant dense<0.000000e+00> : vector<8x256xf32>
    %3 = tpu.matmul %2, %1, %cst {dimension_numbers = #tpu.dot_dimension_numbers<[1], [0], [0], [1], [0, 0, 1, 1], [], []>} : vector<8x8xf32>, vector<8x256xf32>, vector<8x256xf32> -> vector<8x256xf32>
    %cst_4 = arith.constant 0.000000e+00 : f32
    %4 = vector.broadcast %cst_4 : f32 to vector<8x256xf32>
    %5 = arith.maximumf %3, %4 : vector<8x256xf32>
    %c0_5 = arith.constant 0 : index
    %c0_6 = arith.constant 0 : index
    %6 = vector.load %arg4[%c0_5, %c0_6] : memref<8x8xf32, #tpu.memory_space<vmem>>, vector<8x8xf32>
    %cst_7 = arith.constant dense<0.000000e+00> : vector<8x256xf32>
    %7 = tpu.matmul %6, %5, %cst_7 {dimension_numbers = #tpu.dot_dimension_numbers<[1], [0], [0], [1], [0, 0, 1, 1], [], []>} : vector<8x8xf32>, vector<8x256xf32>, vector<8x256xf32> -> vector<8x256xf32>
    %c0_8 = arith.constant 0 : index
    %c0_9 = arith.constant 0 : index
    %c0_10 = arith.constant 0 : index
    %8 = vector.load %arg5[%c0_8, %c0_9, %c0_10] : memref<1x8x256xf32, #tpu.memory_space<vmem>>, vector<1x8x256xf32>
    %9 = vector.shape_cast %8 : vector<1x8x256xf32> to vector<8x256xf32>
    %10 = vector.shape_cast %7 : vector<8x256xf32> to vector<1x8x256xf32>
    tpu.vector_store %arg5[%c0_8, %c0_9, %c0_10], %10 {strides = array<i32>} : memref<1x8x256xf32, #tpu.memory_space<vmem>>, vector<1x8x256xf32>,
    return
  }
  func.func @transform_0(%arg0: i32, %arg1: i32) -> (i32, i32, i32) {
    %c0_i32 = arith.constant 0 : i32
    %c0_i32_0 = arith.constant 0 : i32
    return %arg0, %c0_i32, %arg1 : i32, i32, i32
  }
  func.func @transform_1(%arg0: i32, %arg1: i32) -> (i32, i32) {
    %c0_i32 = arith.constant 0 : i32
    %c0_i32_0 = arith.constant 0 : i32
    %c0_i32_1 = arith.constant 0 : i32
    return %c0_i32, %c0_i32_0 : i32, i32
  }
  func.func @transform_2(%arg0: i32, %arg1: i32) -> (i32, i32) {
    %c0_i32 = arith.constant 0 : i32
    %c0_i32_0 = arith.constant 0 : i32
    %c0_i32_1 = arith.constant 0 : i32
    return %c0_i32, %c0_i32_0 : i32, i32
  }
  func.func @transform_3(%arg0: i32, %arg1: i32) -> (i32, i32, i32) {
    %c0_i32 = arith.constant 0 : i32
    %c0_i32_0 = arith.constant 0 : i32
    return %arg0, %c0_i32, %arg1 : i32, i32, i32
  }
}

</mosaic_0001>

<bundles_post_ra>
// kernel: reverse.1
= control target key start
LH: loop header
LB: loop body
LE: loop exit
PB: predicated region body
PF: predicated region fallthrough
CT: control target
= control target key end

     0   :  { %v71_v3 = vlaneseq  ;;  %v64_v9 = vld [vmem:[#allocation0 + $0x7] ss:$-1 sm:$0xff]  ;;  %v78_v12 = vld [vmem:[#allocation0 + $0x17] ss:$-1 sm:$0xff]  ;;  %s329_s0 = inlined_call_operand.vmem [shape: f32[2,4,16,7], index: 0, kind: input, shape index: {}]   ;;  %s330_s1 = inlined_call_operand.vmem [shape: f32[2,4,16,7], index: 1, kind: output, shape index: {}]  }
   0x1   :  { %v44_v0 = vld [vmem:[%s329_s0] sm:$0xff]  ;;  %v46_v1 = vld [vmem:[%s329_s0 + $0x8] sm:$0xff]  ;;  %v48_v2 = vld [vmem:[%s329_s0 + $0x10] sm:$0xff]  ;;  %v65_v10 = vrot.slane %v64_v9, 1  ;;  %v79_v14 = vrot.slane %v78_v12, 1 }
   0x2   :  { %45 = vst [vmem:[#allocation0 + $0x8] sm:$0xff] %v44_v0  ;;  %47 = vst [vmem:[#allocation0 + $0x18] sm:$0xff] %v46_v1  ;;  %v50_v4 = vld [vmem:[%s329_s0 + $0x18] sm:$0xff]  ;;  %v52_v5 = vld [vmem:[%s329_s0 + $0x20] sm:$0xff]  ;;  %v72_v11 = vshrl.u32 %v71_v3, 7 }
   0x3   :  { %49 = vst [vmem:[#allocation0 + $0x28] sm:$0xff] %v48_v2  ;;  %v54_v6 = vld [vmem:[%s329_s0 + $0x28] sm:$0xff]  ;;  %51 = vst [vmem:[#allocation0 + $0x38] sm:$0xff] %v50_v4  ;;  %v56_v7 = vld [vmem:[%s329_s0 + $0x30] sm:$0xff] }
   0x4   :  { %53 = vst [vmem:[#allocation0 + $0x48] sm:$0xff] %v52_v5  ;;  %55 = vst [vmem:[#allocation0 + $0x58] sm:$0xff] %v54_v6  ;;  %v58_v8 = vld [vmem:[%s329_s0 + $0x38] sm:$0xff]  ;;  %v92_v13 = vld [vmem:[#allocation0 + $0x27] ss:$-1 sm:$0xff]  ;;  %vm73_vm0 = vcmp.lt.s32.totalorder %v72_v11, 7 }
   0x5   :  { %57 = vst [vmem:[#allocation0 + $0x68] sm:$0xff] %v56_v7  ;;  %59 = vst [vmem:[#allocation0 + $0x78] sm:$0xff] %v58_v8  ;;  %v93_v15 = vrot.slane %v92_v13, 1  ;;  %v106_v16 = vld [vmem:[#allocation0 + $0x37] ss:$-1 sm:$0xff] }
   0x6   :  { %66 = vst [vmem:[#allocation1] sm:$0xff] %v65_v10  ;;  %v107_v17 = vrot.slane %v106_v16, 1  ;;  %v120_v18 = vld [vmem:[#allocation0 + $0x47] ss:$-1 sm:$0xff]  ;;  %v134_v19 = vld [vmem:[#allocation0 + $0x57] ss:$-1 sm:$0xff] }
   0x7   :  { %80 = vst [vmem:[#allocation1 + $0x8] sm:$0xff] %v79_v14  ;;  %94 = vst [vmem:[#allocation1 + $0x10] sm:$0xff] %v93_v15  ;;  %v121_v20 = vrot.slane %v120_v18, 1  ;;  %v135_v21 = vrot.slane %v134_v19, 1  ;;  %v148_v22 = vld [vmem:[#allocation0 + $0x67] ss:$-1 sm:$0xff] }
   0x8   :  { %v162_v23 = vld [vmem:[#allocation0 + $0x77] ss:$-1 sm:$0xff]  ;;  %108 = vst [vmem:[#allocation1 + $0x18] sm:$0xff] %v107_v17  ;;  %v149_v24 = vrot.slane %v148_v22, 1 }
   0x9   :  { %v163_v25 = vrot.slane %v162_v23, 1  ;;  %v69_v26 = vld [vmem:[#allocation0 + $0xf] ss:$-1 sm:$0xff]  ;;  %v83_v27 = vld [vmem:[#allocation0 + $0x1f] ss:$-1 sm:$0xff]  ;;  %122 = vst [vmem:[#allocation1 + $0x20] sm:$0xff] %v121_v20 }
   0xa   :  { %v97_v28 = vld [vmem:[#allocation0 + $0x2f] ss:$-1 sm:$0xff]  ;;  %136 = vst [vmem:[#allocation1 + $0x28] sm:$0xff] %v135_v21  ;;  %v70_v29 = vrot.slane %v69_v26, 1  ;;  %v84_v30 = vrot.slane %v83_v27, 1  ;;  %150 = vst [vmem:[#allocation1 + $0x30] sm:$0xff] %v149_v24 }
   0xb   :  { %v98_v31 = vrot.slane %v97_v28, 1  ;;  %v111_v32 = vld [vmem:[#allocation0 + $0x3f] ss:$-1 sm:$0xff]  ;;  %164 = vst [vmem:[#allocation1 + $0x38] sm:$0xff] %v163_v25  ;;  %v125_v34 = vld [vmem:[#allocation0 + $0x4f] ss:$-1 sm:$0xff] }
   0xc   :  { %v112_v33 = vrot.slane %v111_v32, 1  ;;  %v139_v35 = vld [vmem:[#allocation0 + $0x5f] ss:$-1 sm:$0xff]  ;;  %74 = vst.msk [vmem:[#allocation1] sm:$0xff] %vm73_vm0, %v70_v29  ;;  %88 = vst.msk [vmem:[#allocation1 + $0x8] sm:$0xff] %vm73_vm0, %v84_v30  ;;  %v126_v36 = vrot.slane %v125_v34, 1 }
   0xd   :  { %102 = vst.msk [vmem:[#allocation1 + $0x10] sm:$0xff] %vm73_vm0, %v98_v31  ;;  %v140_v37 = vrot.slane %v139_v35, 1  ;;  %v153_v38 = vld [vmem:[#allocation0 + $0x6f] ss:$-1 sm:$0xff]  ;;  %v167_v39 = vld [vmem:[#allocation0 + $0x7f] ss:$-1 sm:$0xff] }
   0xe   :  { %116 = vst.msk [vmem:[#allocation1 + $0x18] sm:$0xff] %vm73_vm0, %v112_v33  ;;  %v154_v40 = vrot.slane %v153_v38, 1  ;;  %v168_v41 = vrot.slane %v167_v39, 1  ;;  %130 = vst.msk [vmem:[#allocation1 + $0x20] sm:$0xff] %vm73_vm0, %v126_v36 }
   0xf   :  { %144 = vst.msk [vmem:[#allocation1 + $0x28] sm:$0xff] %vm73_vm0, %v140_v37 }
  0x10   :  { %158 = vst.msk [vmem:[#allocation1 + $0x30] sm:$0xff] %vm73_vm0, %v154_v40  ;;  %172 = vst.msk [vmem:[#allocation1 + $0x38] sm:$0xff] %vm73_vm0, %v168_v41 }
  0x13   :  { %v214_v42 = vld [vmem:[#allocation1] sm:$0xff]  ;;  %v216_v43 = vld [vmem:[#allocation1 + $0x8] sm:$0xff] }
  0x14   :  { %v218_v44 = vld [vmem:[#allocation1 + $0x10] sm:$0xff]  ;;  %215 = vst [vmem:[%s330_s1] sm:$0xff] %v214_v42  ;;  %217 = vst [vmem:[%s330_s1 + $0x8] sm:$0xff] %v216_v43 }
  0x15   :  { %219 = vst [vmem:[%s330_s1 + $0x10] sm:$0xff] %v218_v44  ;;  %v220_v45 = vld [vmem:[#allocation1 + $0x18] sm:$0xff]  ;;  %v222_v46 = vld [vmem:[#allocation1 + $0x20] sm:$0xff] }
  0x16   :  { %221 = vst [vmem:[%s330_s1 + $0x18] sm:$0xff] %v220_v45  ;;  %v224_v47 = vld [vmem:[#allocation1 + $0x28] sm:$0xff]  ;;  %223 = vst [vmem:[%s330_s1 + $0x20] sm:$0xff] %v222_v46 }
  0x17   :  { %225 = vst [vmem:[%s330_s1 + $0x28] sm:$0xff] %v224_v47  ;;  %v226_v48 = vld [vmem:[#allocation1 + $0x30] sm:$0xff]  ;;  %v228_v49 = vld [vmem:[#allocation1 + $0x38] sm:$0xff] }
  0x18   :  { %227 = vst [vmem:[%s330_s1 + $0x30] sm:$0xff] %v226_v48  ;;  %229 = vst [vmem:[%s330_s1 + $0x38] sm:$0xff] %v228_v49 }

// kernel: fft_block_forward.1
= control target key start
LH: loop header
LB: loop body
LE: loop exit
PB: predicated region body
PF: predicated region fallthrough
CT: control target
= control target key end

     0   :  { %s539_s12 = smov 0   ;;  %s541_s13 = smov 0   ;;  %s578_s0 = inlined_call_operand.vmem [shape: f32[2,8,256], index: 0, kind: input, shape index: {}]   ;;  %s579_s1 = inlined_call_operand.vmem [shape: f32[8,8], index: 1, kind: input, shape index: {}]   ;;  %s580_s2 = inlined_call_operand.vmem [shape: f32[8,8], index: 2, kind: input, shape index: {}]   ;;  %s581_s3 = inlined_call_operand.vmem [shape: f32[2,8,256], index: 3, kind: output, shape index: {}]  }
   0x1   :  { %s543_s14 = smov 0  }
   0x2 LB: > { %s25_s15 = sadd.s32 1, %s512_s13  ;;  %p458_p0 = scmp.ge.s32.totalorder %s516_s14, 1  ;;  %s516_s14 = sphi %s543_s14, %s13_s14   ;;  %s512_s13 = sphi %s541_s13, %s583_s13   ;;  %s508_s12 = sphi %s539_s12, %s582_s12  }
   0x3   : > { %p27_p1 = scmp.ge.s32.totalorder %s25_s15, 2  ;;  %p158_p2 = scmp.lt.s32.totalorder %s516_s14, 3 }
   0x5   : > { %s585_s15 = smov (%p27_p1, %s25_s15), 0  ;;  %p159_p3 = pnand %p458_p0, %p158_p2 }
   0x6   : > { %p191_p4 = scmp.lt.s32.totalorder (!%p159_p3), %s508_s12, 1  ;;  %v518_v0 = vmov (!%p159_p3), 0.0   ;;  %v212_v3 = vld [vmem:[%s579_s1] sm:$0xff] (!%p159_p3)  ;;  %vm213_vm0 = vcmask (!%p159_p3), 64512  }
   0x7   : > { %162 = sbr.rel (%p159_p3) target bundleno = 451 (0x1c3), region = 32  ;;  %281 = vmatprep.mubr.f32.mxu0 (!%p159_p3), %v518_v0  ;;  %358 = vmatprep.mubr.f32.mxu1 (!%p159_p3), %v518_v0  ;;  %v290_v8 = vld [vmem:[%s580_s2] sm:$0xff] (!%p159_p3) }
   0xe   : > { %s587_s12 = smov (!%p191_p4, %s508_s12), 1 }
   0xf   : > { %s467_s16 = sshll.u32 %s587_s12, 4 }
  0x10   : > { %s198_s19 = scalar_lea.vmem %s578_s0, %s467_s16  ;;  %s208_s26 = scalar_lea.vmem %s581_s3, %s467_s16 }
  0x11   : > { %v211_v1 = vld [vmem:[%s198_s19 + $0x8] sm:$0xff]  ;;  %v210_v2 = vld [vmem:[%s198_s19] sm:$0xff] }
  0x12   : > { %217 = vmatprep.subr.mxu0 %v211_v1 }
  0x13   : > { %218 = vmatpush1.msra.mxu0 %v210_v2 }
  0x14   : > { %463 = vmatmul.mubr.msk.f32.vlgmr.msra.gmra.mrb[0].mxu0 %vm213_vm0, %v212_v3 }
  0xe7   : > { %v283_v4 = vpop.f32.mrb[0].mxu0 }
  0xe8   : > { %v285_v5 = vpop.f32.mrb[1].mxu0  ;;  %v288_v7 = vmax.f32 %v283_v4, 0.0 }
  0xe9   : > { %v289_v6 = vmax.f32 %v285_v5, 0.0 }
  0xeb   : > { %294 = vmatprep.subr.mxu1 %v289_v6 }
  0xec   : > { %295 = vmatpush1.msra.mxu1 %v288_v7 }
  0xed   : > { %464 = vmatmul.mubr.msk.f32.vlgmr.msra.gmra.mrb[0].mxu1 %vm213_vm0, %v290_v8 }
 0x1c0   : > { %v360_v9 = vpop.f32.mrb[0].mxu1 }
 0x1c1   : > { %365 = vst [vmem:[%s208_s26] sm:$0xff] %v360_v9  ;;  %v362_v10 = vpop.f32.mrb[1].mxu1 }
 0x1c2   : > { %366 = vst [vmem:[%s208_s26 + $0x8] sm:$0xff] %v362_v10 }
 0x1c3 PF: > { %s13_s14 = sadd.s32 1, %s516_s14   ;;  %s582_s12 = smov %s512_s13 }
 0x1c4   : > { %p10_p5 = scmp.ge.s32.totalorder %s13_s14, 4   ;;  %s583_s13 = smov %s585_s15 }
 0x1c6   :  { %12 = sbr.rel (!%p10_p5) target bundleno = 2 (0x2), region = 62 }

</bundles_post_ra>
